<compile_context>
chip_gen: v7x
topology: tpu7x:2x2x1
jax: 0.10.0
libtpu: 0.0.40
codegen_flags: <defaults>
</compile_context>

<pallas_src>
import functools

import jax
import jax.numpy as jnp
from jax.experimental import pallas as pl
from jax.experimental.pallas import tpu as pltpu


def _round_up(x, m):
    return ((x + m - 1) // m) * m


# ---------------------------------------------------------------------------
# Fused S2T kernel (single block, no grid: workload is launch/DMA latency
# bound at these sizes, so everything stays resident in VMEM).
# ---------------------------------------------------------------------------
def _s2t_fused_kernel(x_ref, lab_ref,
                      wconv_ref, bconv_ref,
                      wgloss_ref, bgloss_ref,
                      wmap1_ref, bmap1_ref,
                      wmap2_ref, bmap2_ref,
                      wtxt_ref, btxt_ref,
                      slab_ref, loss_ref,
                      *, T, slab_pad, compute_rec_loss):
    M, C = x_ref.shape
    V = wtxt_ref.shape[1]
    f32 = jnp.float32
    bf16 = jnp.bfloat16

    # -- recognition_network: temporal conv1d (kernel=3, 'same') + ReLU -------
    # One MXU dot on an (M, 3C) im2col slab built in VMEM. Shifted taps come
    # from XLU sublane rotations; rows that wrapped across a batch boundary
    # (or around the ends) are zeroed -> exact 'same' zero padding in-kernel.
    x = x_ref[...]                                               # (M, C) f32
    row = jax.lax.broadcasted_iota(jnp.int32, (M, 1), 0)
    t_idx = jax.lax.rem(row, jnp.int32(T))                       # batch-local t
    x_prev = jnp.where(t_idx == 0, 0.0, pltpu.roll(x, shift=1, axis=0))
    x_next = jnp.where(t_idx == T - 1, 0.0, pltpu.roll(x, shift=M - 1, axis=0))
    im2col = jnp.concatenate([x_prev, x, x_next], axis=1)        # (M, 3C) f32
    acc = jnp.dot(im2col.astype(bf16), wconv_ref[...],
                  preferred_element_type=f32)                    # (M, H)
    feat = jnp.maximum(acc + bconv_ref[...], 0.0)                # f32
    feat_bf = feat.astype(bf16)

    # -- gloss classifier head + log-softmax ----------------------------------
    gloss_logits = (jnp.dot(feat_bf, wgloss_ref[...], preferred_element_type=f32)
                    + bgloss_ref[...])                           # (M, GV)
    gmax = jnp.max(gloss_logits, axis=-1, keepdims=True)
    gsh = gloss_logits - gmax
    glse = jnp.log(jnp.sum(jnp.exp(gsh), axis=-1, keepdims=True))
    glogp = gsh - glse                                           # (M, GV)

    if compute_rec_loss:
        # TODO(synk): real CTC recognition loss / beam decoding has no clean
        # Pallas equivalent; mean blank-NLL (class 0) stand-in, built from the
        # already-available shifted logits + lse (no extra pass over glogp).
        rec_loss = -(jnp.sum(gsh[:, 0:1]) - jnp.sum(glse)) / M
    else:
        rec_loss = jnp.float32(0.0)      # recognition_weight == 0: dead work

    # -- VLMapper: Linear -> ReLU -> Linear -----------------------------------
    h = jnp.maximum(jnp.dot(feat_bf, wmap1_ref[...], preferred_element_type=f32)
                    + bmap1_ref[...], 0.0)                       # (M, D)
    mapped = (jnp.dot(h.astype(bf16), wmap2_ref[...], preferred_element_type=f32)
              + bmap2_ref[...])                                  # (M, D) f32

    # -- translation_network: LM head + label NLL -----------------------------
    # TODO(synk): real translation_network is a pretrained mBART enc-dec.
    # NLL is computed from shifted logits + per-row lse; the full (M, V)
    # log-prob tensor is never materialized.
    txt_logits = (jnp.dot(mapped.astype(bf16), wtxt_ref[...],
                          preferred_element_type=f32)
                  + btxt_ref[...])                               # (M, V)
    tmax = jnp.max(txt_logits, axis=-1, keepdims=True)
    tsh = txt_logits - tmax
    tlse = jnp.log(jnp.sum(jnp.exp(tsh), axis=-1, keepdims=True))  # (M, 1)
    labels = lab_ref[...]                                        # (M, 1) int32
    vids = jax.lax.broadcasted_iota(jnp.int32, (M, V), 1)
    picked = jnp.where(vids == labels, tsh, 0.0)                 # one-hot gather
    trans_loss = -(jnp.sum(picked) - jnp.sum(tlse)) / M

    # -- lane-dense packed output slab (single unmasked writeback) ------------
    parts = [feat, gloss_logits, glogp, mapped]
    if slab_pad > 0:
        parts.append(jnp.zeros((M, slab_pad), f32))
    slab_ref[...] = jnp.concatenate(parts, axis=1)

    loss_ref[0] = rec_loss
    loss_ref[1] = trans_loss


def s2t_fused_forward(x2d, labels2d,
                      w_conv, b_conv, w_gloss, b_gloss,
                      w_map1, b_map1, w_map2, b_map2, w_txt, b_txt,
                      *, T, H, GV, D, compute_rec_loss):
    """Single-launch fused S2T forward.

    x2d     : [B*T, C]  f32 features (unpadded; conv padding handled in-kernel)
    labels2d: [B*T, 1]  int32 text labels
    returns : feat [B*T,H], gloss_logits [B*T,GV], gloss_log_probs [B*T,GV],
              mapped [B*T,D], losses [2] (= [recognition_loss, translation_loss])
    """
    M = x2d.shape[0]
    used = H + GV + GV + D
    slab_w = _round_up(used, 128)
    kern = functools.partial(_s2t_fused_kernel, T=T, slab_pad=slab_w - used,
                             compute_rec_loss=compute_rec_loss)
    vmem = lambda: pl.BlockSpec(memory_space=pltpu.MemorySpace.VMEM)
    slab, losses = pl.pallas_call(
        kern,
        out_shape=(
            jax.ShapeDtypeStruct((M, slab_w), jnp.float32),
            jax.ShapeDtypeStruct((2,), jnp.float32),
        ),
        in_specs=[vmem() for _ in range(12)],
        out_specs=(vmem(), pl.BlockSpec(memory_space=pltpu.MemorySpace.SMEM)),
    )(x2d, labels2d, w_conv, b_conv, w_gloss, b_gloss,
      w_map1, b_map1, w_map2, b_map2, w_txt, b_txt)

    feat = slab[:, :H]
    gloss_logits = slab[:, H:H + GV]
    gloss_log_probs = slab[:, H + GV:H + 2 * GV]
    mapped = slab[:, H + 2 * GV:H + 2 * GV + D]
    return feat, gloss_logits, gloss_log_probs, mapped, losses


# ---------------------------------------------------------------------------
# Model (S2T branch of SignLanguageModel)
# ---------------------------------------------------------------------------
class SignLanguageModelPallas:
    def __init__(self, key, *, in_features=32, hidden_size=32, gloss_vocab=16,
                 translation_input_dim=32, text_vocab=32,
                 recognition_weight=0.0, translation_weight=1.0):
        self.recognition_weight = recognition_weight
        self.translation_weight = translation_weight
        self.in_features = in_features
        self.hidden_size = hidden_size
        self.gloss_vocab = gloss_vocab
        self.translation_input_dim = translation_input_dim
        self.text_vocab = text_vocab

        ks = jax.random.split(key, 5)
        scale = 0.02
        # recognition_network: temporal conv1d (kernel=3, same padding) + ReLU.
        # Stored as the im2col [3*C_in, H] layout, tap order (t-1, t, t+1).
        # Weights live in bf16 (MXU operands); biases stay f32.
        self.w_conv = (scale * jax.random.normal(
            ks[0], (3 * in_features, hidden_size), jnp.float32)).astype(jnp.bfloat16)
        self.b_conv = jnp.zeros((1, hidden_size), jnp.float32)
        # gloss classifier head
        self.w_gloss = (scale * jax.random.normal(
            ks[1], (hidden_size, gloss_vocab), jnp.float32)).astype(jnp.bfloat16)
        self.b_gloss = jnp.zeros((1, gloss_vocab), jnp.float32)
        # VLMapper: Linear -> ReLU -> Linear
        self.w_map1 = (scale * jax.random.normal(
            ks[2], (hidden_size, translation_input_dim), jnp.float32)).astype(jnp.bfloat16)
        self.b_map1 = jnp.zeros((1, translation_input_dim), jnp.float32)
        self.w_map2 = (scale * jax.random.normal(
            ks[3], (translation_input_dim, translation_input_dim),
            jnp.float32)).astype(jnp.bfloat16)
        self.b_map2 = jnp.zeros((1, translation_input_dim), jnp.float32)
        # translation_network LM head
        self.w_txt = (scale * jax.random.normal(
            ks[4], (translation_input_dim, text_vocab), jnp.float32)).astype(jnp.bfloat16)
        self.b_txt = jnp.zeros((1, text_vocab), jnp.float32)

    # -- SignLanguageModel.forward (task == 'S2T') ---------------------------
    def forward(self, is_train, translation_inputs=None, recognition_inputs=None):
        translation_inputs = dict(translation_inputs or {})
        recognition_inputs = dict(recognition_inputs or {})

        sgn_features = recognition_inputs["sgn_features"]      # [B, T, C]
        sgn_lengths = recognition_inputs["sgn_lengths"]        # [B]
        labels = translation_inputs["labels"]                  # [B, T] int

        B, T, C = sgn_features.shape
        H, GV = self.hidden_size, self.gloss_vocab
        D = self.translation_input_dim

        # Contiguous (B,T,C)->(B*T,C) reshape is free in XLA; conv 'same'
        # padding and tap shifts happen in-kernel.
        x2d = sgn_features.reshape(B * T, C).astype(jnp.float32)
        labels2d = labels.reshape(B * T, 1).astype(jnp.int32)

        feat, gloss_logits, gloss_log_probs, mapped, losses = s2t_fused_forward(
            x2d, labels2d,
            self.w_conv, self.b_conv, self.w_gloss, self.b_gloss,
            self.w_map1, self.b_map1, self.w_map2, self.b_map2,
            self.w_txt, self.b_txt,
            T=T, H=H, GV=GV, D=D,
            compute_rec_loss=(self.recognition_weight != 0.0))

        recognition_loss = losses[0]
        translation_loss = losses[1]
        mapped_feature = mapped.reshape(B, T, D)

        recognition_outputs = {
            "gloss_feature": feat.reshape(B, T, H),
            "gloss_logits": gloss_logits.reshape(B, T, GV),
            "gloss_probabilities_log": gloss_log_probs.reshape(B, T, GV),
            "recognition_loss": recognition_loss,
            "input_lengths": sgn_lengths,
        }
        translation_outputs = {
            "transformer_inputs": {
                "inputs_embeds": mapped_feature,
                "input_lengths": sgn_lengths,
            },
            "translation_loss": translation_loss,
        }
        model_outputs = {**translation_outputs, **recognition_outputs}
        model_outputs["transformer_inputs"] = model_outputs["transformer_inputs"]
        model_outputs["total_loss"] = (
            model_outputs["recognition_loss"] * self.recognition_weight
            + model_outputs["translation_loss"] * self.translation_weight)
        return model_outputs


# ---------------------------------------------------------------------------
if __name__ == "__main__":
    key = jax.random.PRNGKey(0)
    k_model, k_feat, k_lab = jax.random.split(key, 3)

    B, T, C_IN = 2, 8, 32          # batch, frames, visual feature dim
    HIDDEN, GLOSS_V = 32, 16       # visual head hidden size, gloss vocab
    TRANS_D, TEXT_V = 32, 32       # translation input dim, text vocab

    model = SignLanguageModelPallas(
        k_model, in_features=C_IN, hidden_size=HIDDEN, gloss_vocab=GLOSS_V,
        translation_input_dim=TRANS_D, text_vocab=TEXT_V,
        recognition_weight=0.0, translation_weight=1.0)

    sgn_features = jax.random.normal(k_feat, (B, T, C_IN), jnp.float32)
    sgn_lengths = jnp.full((B,), T, jnp.int32)
    labels = jax.random.randint(k_lab, (B, T), 0, TEXT_V, jnp.int32)

    outputs = model.forward(
        is_train=True,
        translation_inputs={"labels": labels},
        recognition_inputs={"sgn_features": sgn_features,
                            "sgn_lengths": sgn_lengths},
    )

    jax.block_until_ready(outputs["total_loss"])
    jax.block_until_ready(outputs["gloss_logits"])
    assert outputs["gloss_logits"].shape == (B, T, GLOSS_V)
    assert outputs["gloss_probabilities_log"].shape == (B, T, GLOSS_V)
    assert outputs["transformer_inputs"]["inputs_embeds"].shape == (B, T, TRANS_D)
    assert outputs["total_loss"].shape == ()
    assert bool(jnp.isfinite(outputs["total_loss"]))
    print("KERNEL_OK")
</pallas_src>

<mosaic_0001>
module attributes {stable_mosaic.version = 11 : i64} {
  func.func @_s2t_fused_kernel(%arg0: memref<16x32xf32, #tpu.memory_space<vmem>>, %arg1: memref<16x1xi32, #tpu.memory_space<vmem>>, %arg2: memref<96x32xbf16, #tpu.memory_space<vmem>>, %arg3: memref<1x32xf32, #tpu.memory_space<vmem>>, %arg4: memref<32x16xbf16, #tpu.memory_space<vmem>>, %arg5: memref<1x16xf32, #tpu.memory_space<vmem>>, %arg6: memref<32x32xbf16, #tpu.memory_space<vmem>>, %arg7: memref<1x32xf32, #tpu.memory_space<vmem>>, %arg8: memref<32x32xbf16, #tpu.memory_space<vmem>>, %arg9: memref<1x32xf32, #tpu.memory_space<vmem>>, %arg10: memref<32x32xbf16, #tpu.memory_space<vmem>>, %arg11: memref<1x32xf32, #tpu.memory_space<vmem>>, %arg12: memref<16x128xf32, #tpu.memory_space<vmem>>, %arg13: memref<2xf32, #tpu.memory_space<smem>>) attributes {dimension_semantics = [], scalar_prefetch = 0 : i64, scratch_operands = 0 : i64, tpu.core_type = #tpu.core_type<tc>} {
    %c0 = arith.constant 0 : index
    %c0_0 = arith.constant 0 : index
    %0 = vector.load %arg0[%c0, %c0_0] : memref<16x32xf32, #tpu.memory_space<vmem>>, vector<16x32xf32>
    %1 = tpu.iota {dimensions = array<i32: 0>} : vector<16x1xi32>
    %c8_i32 = arith.constant 8 : i32
    %2 = vector.broadcast %c8_i32 : i32 to vector<16x1xi32>
    %3 = arith.remsi %1, %2 : vector<16x1xi32>
    %c0_i32 = arith.constant 0 : i32
    %4 = vector.broadcast %c0_i32 : i32 to vector<16x1xi32>
    %5 = arith.cmpi eq, %3, %4 : vector<16x1xi32>
    %c1_i32 = arith.constant 1 : i32
    %6 = tpu.dynamic_rotate %0 by %c1_i32 dim 0 : vector<16x32xf32>, i32 -> vector<16x32xf32>
    %cst = arith.constant 0.000000e+00 : f32
    %7 = vector.shape_cast %5 : vector<16x1xi1> to vector<16x1xi1>
    %8 = vector.broadcast %7 : vector<16x1xi1> to vector<16x32xi1>
    %9 = vector.broadcast %cst : f32 to vector<16x32xf32>
    %10 = arith.select %8, %9, %6 : vector<16x32xi1>, vector<16x32xf32>
    %c7_i32 = arith.constant 7 : i32
    %11 = vector.broadcast %c7_i32 : i32 to vector<16x1xi32>
    %12 = arith.cmpi eq, %3, %11 : vector<16x1xi32>
    %c15_i32 = arith.constant 15 : i32
    %13 = tpu.dynamic_rotate %0 by %c15_i32 dim 0 : vector<16x32xf32>, i32 -> vector<16x32xf32>
    %cst_1 = arith.constant 0.000000e+00 : f32
    %14 = vector.shape_cast %12 : vector<16x1xi1> to vector<16x1xi1>
    %15 = vector.broadcast %14 : vector<16x1xi1> to vector<16x32xi1>
    %16 = vector.broadcast %cst_1 : f32 to vector<16x32xf32>
    %17 = arith.select %15, %16, %13 : vector<16x32xi1>, vector<16x32xf32>
    %18 = tpu.concatenate %10, %0, %17 in 1 : vector<16x32xf32>, vector<16x32xf32>, vector<16x32xf32> -> vector<16x96xf32>
    %19 = arith.truncf %18 : vector<16x96xf32> to vector<16x96xbf16>
    %c0_2 = arith.constant 0 : index
    %c0_3 = arith.constant 0 : index
    %20 = vector.load %arg2[%c0_2, %c0_3] : memref<96x32xbf16, #tpu.memory_space<vmem>>, vector<96x32xbf16>
    %cst_4 = arith.constant dense<0.000000e+00> : vector<16x32xf32>
    %21 = tpu.matmul %19, %20, %cst_4 {dimension_numbers = #tpu.dot_dimension_numbers<[1], [0], [0], [1], [0, 0, 1, 1], [], []>} : vector<16x96xbf16>, vector<96x32xbf16>, vector<16x32xf32> -> vector<16x32xf32>
    %c0_5 = arith.constant 0 : index
    %c0_6 = arith.constant 0 : index
    %22 = vector.load %arg3[%c0_5, %c0_6] : memref<1x32xf32, #tpu.memory_space<vmem>>, vector<1x32xf32>
    %23 = vector.broadcast %22 : vector<1x32xf32> to vector<16x32xf32>
    %24 = arith.addf %21, %23 : vector<16x32xf32>
    %cst_7 = arith.constant 0.000000e+00 : f32
    %25 = vector.broadcast %cst_7 : f32 to vector<16x32xf32>
    %26 = arith.maximumf %24, %25 : vector<16x32xf32>
    %27 = arith.truncf %26 : vector<16x32xf32> to vector<16x32xbf16>
    %c0_8 = arith.constant 0 : index
    %c0_9 = arith.constant 0 : index
    %28 = vector.load %arg4[%c0_8, %c0_9] : memref<32x16xbf16, #tpu.memory_space<vmem>>, vector<32x16xbf16>
    %cst_10 = arith.constant dense<0.000000e+00> : vector<16x16xf32>
    %29 = tpu.matmul %27, %28, %cst_10 {dimension_numbers = #tpu.dot_dimension_numbers<[1], [0], [0], [1], [0, 0, 1, 1], [], []>} : vector<16x32xbf16>, vector<32x16xbf16>, vector<16x16xf32> -> vector<16x16xf32>
    %c0_11 = arith.constant 0 : index
    %c0_12 = arith.constant 0 : index
    %30 = vector.load %arg5[%c0_11, %c0_12] : memref<1x16xf32, #tpu.memory_space<vmem>>, vector<1x16xf32>
    %31 = vector.broadcast %30 : vector<1x16xf32> to vector<16x16xf32>
    %32 = arith.addf %29, %31 : vector<16x16xf32>
    %cst_13 = arith.constant dense<0xFF800000> : vector<16xf32>
    %33 = vector.multi_reduction <maximumf>, %32, %cst_13 [1] : vector<16x16xf32> to vector<16xf32>
    %34 = vector.shape_cast %33 : vector<16xf32> to vector<16x1xf32>
    %35 = vector.broadcast %34 : vector<16x1xf32> to vector<16x16xf32>
    %36 = arith.subf %32, %35 : vector<16x16xf32>
    %37 = math.exp %36 : vector<16x16xf32>
    %cst_14 = arith.constant dense<0.000000e+00> : vector<16xf32>
    %38 = vector.multi_reduction <add>, %37, %cst_14 [1] : vector<16x16xf32> to vector<16xf32>
    %39 = vector.shape_cast %38 : vector<16xf32> to vector<16x1xf32>
    %40 = math.log %39 : vector<16x1xf32>
    %41 = vector.broadcast %40 : vector<16x1xf32> to vector<16x16xf32>
    %42 = arith.subf %36, %41 : vector<16x16xf32>
    %c0_15 = arith.constant 0 : index
    %c0_16 = arith.constant 0 : index
    %43 = vector.load %arg6[%c0_15, %c0_16] : memref<32x32xbf16, #tpu.memory_space<vmem>>, vector<32x32xbf16>
    %cst_17 = arith.constant dense<0.000000e+00> : vector<16x32xf32>
    %44 = tpu.matmul %27, %43, %cst_17 {dimension_numbers = #tpu.dot_dimension_numbers<[1], [0], [0], [1], [0, 0, 1, 1], [], []>} : vector<16x32xbf16>, vector<32x32xbf16>, vector<16x32xf32> -> vector<16x32xf32>
    %c0_18 = arith.constant 0 : index
    %c0_19 = arith.constant 0 : index
    %45 = vector.load %arg7[%c0_18, %c0_19] : memref<1x32xf32, #tpu.memory_space<vmem>>, vector<1x32xf32>
    %46 = vector.broadcast %45 : vector<1x32xf32> to vector<16x32xf32>
    %47 = arith.addf %44, %46 : vector<16x32xf32>
    %cst_20 = arith.constant 0.000000e+00 : f32
    %48 = vector.broadcast %cst_20 : f32 to vector<16x32xf32>
    %49 = arith.maximumf %47, %48 : vector<16x32xf32>
    %50 = arith.truncf %49 : vector<16x32xf32> to vector<16x32xbf16>
    %c0_21 = arith.constant 0 : index
    %c0_22 = arith.constant 0 : index
    %51 = vector.load %arg8[%c0_21, %c0_22] : memref<32x32xbf16, #tpu.memory_space<vmem>>, vector<32x32xbf16>
    %cst_23 = arith.constant dense<0.000000e+00> : vector<16x32xf32>
    %52 = tpu.matmul %50, %51, %cst_23 {dimension_numbers = #tpu.dot_dimension_numbers<[1], [0], [0], [1], [0, 0, 1, 1], [], []>} : vector<16x32xbf16>, vector<32x32xbf16>, vector<16x32xf32> -> vector<16x32xf32>
    %c0_24 = arith.constant 0 : index
    %c0_25 = arith.constant 0 : index
    %53 = vector.load %arg9[%c0_24, %c0_25] : memref<1x32xf32, #tpu.memory_space<vmem>>, vector<1x32xf32>
    %54 = vector.broadcast %53 : vector<1x32xf32> to vector<16x32xf32>
    %55 = arith.addf %52, %54 : vector<16x32xf32>
    %56 = arith.truncf %55 : vector<16x32xf32> to vector<16x32xbf16>
    %c0_26 = arith.constant 0 : index
    %c0_27 = arith.constant 0 : index
    %57 = vector.load %arg10[%c0_26, %c0_27] : memref<32x32xbf16, #tpu.memory_space<vmem>>, vector<32x32xbf16>
    %cst_28 = arith.constant dense<0.000000e+00> : vector<16x32xf32>
    %58 = tpu.matmul %56, %57, %cst_28 {dimension_numbers = #tpu.dot_dimension_numbers<[1], [0], [0], [1], [0, 0, 1, 1], [], []>} : vector<16x32xbf16>, vector<32x32xbf16>, vector<16x32xf32> -> vector<16x32xf32>
    %c0_29 = arith.constant 0 : index
    %c0_30 = arith.constant 0 : index
    %59 = vector.load %arg11[%c0_29, %c0_30] : memref<1x32xf32, #tpu.memory_space<vmem>>, vector<1x32xf32>
    %60 = vector.broadcast %59 : vector<1x32xf32> to vector<16x32xf32>
    %61 = arith.addf %58, %60 : vector<16x32xf32>
    %cst_31 = arith.constant dense<0xFF800000> : vector<16xf32>
    %62 = vector.multi_reduction <maximumf>, %61, %cst_31 [1] : vector<16x32xf32> to vector<16xf32>
    %63 = vector.shape_cast %62 : vector<16xf32> to vector<16x1xf32>
    %64 = vector.broadcast %63 : vector<16x1xf32> to vector<16x32xf32>
    %65 = arith.subf %61, %64 : vector<16x32xf32>
    %66 = math.exp %65 : vector<16x32xf32>
    %cst_32 = arith.constant dense<0.000000e+00> : vector<16xf32>
    %67 = vector.multi_reduction <add>, %66, %cst_32 [1] : vector<16x32xf32> to vector<16xf32>
    %68 = vector.shape_cast %67 : vector<16xf32> to vector<16x1xf32>
    %69 = math.log %68 : vector<16x1xf32>
    %c0_33 = arith.constant 0 : index
    %c0_34 = arith.constant 0 : index
    %70 = vector.load %arg1[%c0_33, %c0_34] : memref<16x1xi32, #tpu.memory_space<vmem>>, vector<16x1xi32>
    %71 = tpu.iota {dimensions = array<i32: 1>} : vector<16x32xi32>
    %72 = vector.broadcast %70 : vector<16x1xi32> to vector<16x32xi32>
    %73 = arith.cmpi eq, %71, %72 : vector<16x32xi32>
    %cst_35 = arith.constant 0.000000e+00 : f32
    %74 = vector.broadcast %cst_35 : f32 to vector<16x32xf32>
    %75 = arith.select %73, %65, %74 : vector<16x32xi1>, vector<16x32xf32>
    %76 = vector.shape_cast %75 : vector<16x32xf32> to vector<1x16x32xf32>
    %cst_36 = arith.constant dense<0.000000e+00> : vector<1xf32>
    %77 = vector.multi_reduction <add>, %76, %cst_36 [1, 2] : vector<1x16x32xf32> to vector<1xf32>
    %78 = vector.shape_cast %77 : vector<1xf32> to vector<1x1x1xf32>
    %79 = vector.extract %78[0, 0, 0] : f32 from vector<1x1x1xf32>
    %80 = vector.shape_cast %69 : vector<16x1xf32> to vector<1x16x1xf32>
    %cst_37 = arith.constant dense<0.000000e+00> : vector<1xf32>
    %81 = vector.multi_reduction <add>, %80, %cst_37 [1, 2] : vector<1x16x1xf32> to vector<1xf32>
    %82 = vector.shape_cast %81 : vector<1xf32> to vector<1x1x1xf32>
    %83 = vector.extract %82[0, 0, 0] : f32 from vector<1x1x1xf32>
    %84 = arith.subf %79, %83 : f32
    %cst_38 = arith.constant 0.000000e+00 : f32
    %85 = arith.subf %cst_38, %84 : f32
    %cst_39 = arith.constant 1.600000e+01 : f32
    %86 = arith.divf %85, %cst_39 : f32
    %cst_40 = arith.constant 0.000000e+00 : f32
    %87 = vector.broadcast %cst_40 : f32 to vector<16x32xf32>
    %88 = tpu.concatenate %26, %32, %42, %55, %87 in 1 : vector<16x32xf32>, vector<16x16xf32>, vector<16x16xf32>, vector<16x32xf32>, vector<16x32xf32> -> vector<16x128xf32>
    %c0_41 = arith.constant 0 : index
    %c0_42 = arith.constant 0 : index
    %89 = vector.load %arg12[%c0_41, %c0_42] : memref<16x128xf32, #tpu.memory_space<vmem>>, vector<16x128xf32>
    tpu.vector_store %arg12[%c0_41, %c0_42], %88 {strides = array<i32>} : memref<16x128xf32, #tpu.memory_space<vmem>>, vector<16x128xf32>,
    %cst_43 = arith.constant 0.000000e+00 : f32
    %c0_44 = arith.constant 0 : index
    %90 = memref.load %arg13[%c0_44] : memref<2xf32, #tpu.memory_space<smem>>
    memref.store %cst_43, %arg13[%c0_44] : memref<2xf32, #tpu.memory_space<smem>>
    %c1 = arith.constant 1 : index
    %91 = memref.load %arg13[%c1] : memref<2xf32, #tpu.memory_space<smem>>
    memref.store %86, %arg13[%c1] : memref<2xf32, #tpu.memory_space<smem>>
    return
  }
}

</mosaic_0001>

<bundles_post_ra>
// kernel: tpu_custom_call.1
= control target key start
LH: loop header
LB: loop body
LE: loop exit
PB: predicated region body
PF: predicated region fallthrough
CT: control target
= control target key end

     0   :  { %19 = vsyncpa [#allocation3], 0  ;;  %v48_v2 = vlaneseq  ;;  %v829_v8 = vmov 0.0   ;;  %vm831_vm6 = vmmov 0   ;;  %s832_s20 = smov 64   ;;  %s1114_s0 = inlined_call_operand.vmem [shape: f32[16,32], index: 0, kind: input, shape index: {}]   ;;  %s1115_s1 = inlined_call_operand.vmem [shape: s32[16,1], index: 1, kind: input, shape index: {}]   ;;  %s1116_s2 = inlined_call_operand.vmem [shape: bf16[96,32], index: 2, kind: input, shape index: {}]   ;;  %s1117_s3 = inlined_call_operand.vmem [shape: f32[1,32], index: 3, kind: input, shape index: {}]   ;;  %s1118_s4 = inlined_call_operand.vmem [shape: bf16[32,16], index: 4, kind: input, shape index: {}]   ;;  %s1119_s5 = inlined_call_operand.vmem [shape: f32[1,16], index: 5, kind: input, shape index: {}]   ;;  %s1120_s6 = inlined_call_operand.vmem [shape: bf16[32,32], index: 6, kind: input, shape index: {}]   ;;  %s1121_s7 = inlined_call_operand.vmem [shape: f32[1,32], index: 7, kind: input, shape index: {}]   ;;  %s1122_s8 = inlined_call_operand.vmem [shape: bf16[32,32], index: 8, kind: input, shape index: {}]   ;;  %s1123_s9 = inlined_call_operand.vmem [shape: f32[1,32], index: 9, kind: input, shape index: {}]   ;;  %s1124_s10 = inlined_call_operand.vmem [shape: bf16[32,32], index: 10, kind: input, shape index: {}]   ;;  %s1125_s11 = inlined_call_operand.vmem [shape: f32[1,32], index: 11, kind: input, shape index: {}]   ;;  %s1126_s12 = inlined_call_operand.hbm [shape: f32[16,128], index: 12, kind: output, shape index: {0}]   ;;  %s1127_s13 = inlined_call_operand.hbm [shape: f32[2], index: 13, kind: output, shape index: {1}]  }
   0x1   :  { %v46_v0 = vld [vmem:[%s1114_s0] sm:$0xff]  ;;  %v47_v1 = vld [vmem:[%s1114_s0 + $0x8] sm:$0xff]  ;;  %688 = vmatprep.subr.bf16.mxu0 %v829_v8  ;;  %704 = vmatprep.subr.bf16.mxu1 %v829_v8  ;;  %s830_s0 = smov 32   ;;  %v765_v18 = vld [vmem:[%s1116_s2 + $0x10] sm:$0xff]  }
   0x2   :  { %v763_v3 = vld [vmem:[%s1116_s2] sm:$0xff]   ;;  %v68_v4 = vrot.slane %v47_v1, 7  ;;  %v81_v5 = vrot.slane %v47_v1, 1  ;;  %v751_v6 = vpack.i.bf16 %v47_v1, %v46_v0  ;;  %v67_v7 = vrot.slane %v46_v0, 7  ;;  %v764_v9 = vld [vmem:[%s1116_s2 + $0x8] sm:$0xff]   ;;  %v766_v26 = vld [vmem:[%s1116_s2 + $0x18] sm:$0xff]   ;;  %700 = vmatprep.mubr.msk.bf16.mxu0 %vm831_vm6, %v829_v8  ;;  %708 = vmatprep.mubr.msk.bf16.mxu1 %vm831_vm6, %v829_v8 }
   0x3   :  { %v80_v10 = vrot.slane %v46_v0, 1  ;;  %v49_v11 = vshrl.u32 %v48_v2, 7  ;;  %689 = vmatpush3.bf16.msra.mxu0 %v763_v3  ;;  %v767_v29 = vld [vmem:[%s1116_s2 + $0x20] sm:$0xff]  }
   0x4   :  { %752 = vrot.lane.b32.xlu0 %v751_v6, %s830_s0  ;;  %690 = vmatprep.subr.bf16.mxu0 %v829_v8 }
   0x5   :  { %v50_v12 = vadd.s32 8, %v49_v11  ;;  %v55_v13 = vand.u32 7, %v49_v11  ;;  %vm82_vm0 = vcmp.lt.s32.totalorder %v49_v11, 7  ;;  %vm69_vm1 = vcmp.lt.s32.totalorder %v49_v11, 1 }
   0x6   :  { %v83_v14 = vsel %vm82_vm0, %v80_v10, %v81_v5  ;;  %v84_v15 = vsel %vm82_vm0, %v81_v5, %v80_v10  ;;  %v70_v20 = vsel %vm69_vm1, %v67_v7, %v68_v4  ;;  %v71_v22 = vsel %vm69_vm1, %v68_v4, %v67_v7 }
   0x7   :  { %v62_v16 = vand.u32 7, %v50_v12  ;;  %vm927_vm2 = vcmp.eq.s32.totalorder %v55_v13, 7  ;;  %691 = vmatpush3.bf16.msra.mxu0 %v764_v9  ;;  %vm934_vm3 = vcmp.eq.s32.totalorder %v55_v13, 0 }
   0x8   :  { %v89_v21 = vsel %vm927_vm2, 0.0, %v83_v14  ;;  %692 = vmatprep.subr.bf16.mxu0 %v829_v8  ;;  %v76_v24 = vsel %vm934_vm3, 0.0, %v71_v22 }
   0x9   :  { %vm79_vm4 = vcmp.eq.s32.totalorder %v62_v16, 7  ;;  %vm941_vm5 = vcmp.eq.s32.totalorder %v62_v16, 0 }
   0xa   :  { %v90_v25 = vsel %vm79_vm4, 0.0, %v84_v15  ;;  %v77_v27 = vsel %vm941_vm5, 0.0, %v70_v20 }
   0xb   :  { %v756_v28 = vpack.i.bf16 %v90_v25, %v89_v21  ;;  %693 = vmatpush3.bf16.msra.mxu0 %v765_v18 }
   0xc   :  { %694 = vmatprep.subr.bf16.mxu0 %v829_v8 }
   0xd   :  { %757 = vrot.lane.b32.xlu0 %v756_v28, %s832_s20 }
   0xf   :  { %695 = vmatpush3.bf16.msra.mxu0 %v766_v26 }
  0x10   :  { %696 = vmatprep.subr.bf16.mxu0 %v829_v8 }
  0x11   :  { %20 = vsyncpa [#allocation4], 0  ;;  %v768_v30 = vld [vmem:[%s1116_s2 + $0x28] sm:$0xff]   ;;  %vm107_vm7 = vcmask 261120   ;;  %vm110_vm8 = vcmask 523264   ;;  %vm169_vm9 = vcmask 785408  }
  0x12   :  { %v769_v42 = vld [vmem:[%s1118_s4] sm:$0xff]   ;;  %v770_v43 = vld [vmem:[%s1118_s4 + $0x8] sm:$0xff]   ;;  %vm284_vm10 = vcmask 130048   ;;  %v833_v28 = vmov 0   ;;  %vm559_vm13 = vcmask 7168   ;;  %s835_s28 = smov 0.0  }
  0x13   :  { %697 = vmatpush3.bf16.msra.mxu0 %v767_v29  ;;  %705 = vmatpush3.bf16.msra.mxu1 %v769_v42  ;;  %v645_v44 = vld [vmem:[%s1117_s3] ss:$0 sm:$0xff]  ;;  %v772_v55 = vld [vmem:[%s1120_s6 + $0x8] sm:$0xff]   ;;  %613 = sst [smem:[#allocation5]] %s835_s28  ;;  %vm603_vm14 = vcmask 392192  }
  0x14   :  { %698 = vmatprep.subr.bf16.mxu0 %v829_v8  ;;  %706 = vmatprep.subr.bf16.mxu1 %v829_v8  ;;  %v771_v53 = vld [vmem:[%s1120_s6] sm:$0xff]   ;;  %v774_v57 = vld [vmem:[%s1122_s8 + $0x8] sm:$0xff]  }
  0x15   :  { %v773_v56 = vld [vmem:[%s1122_s8] sm:$0xff]   ;;  %v776_v15 = vld [vmem:[%s1124_s10 + $0x8] sm:$0xff]   ;;  %761 = vset.pattern.permute.xlu1 %v833_v28  ;;  %762 = vset.pattern.permute.xlu0 %v833_v28 }
  0x16   :  { %v653_v58 = vld [vmem:[%s1119_s5] ss:$0 sm:$0xff] }
  0x17   :  { %699 = vmatpush3.bf16.msra.mxu0 %v768_v30  ;;  %707 = vmatpush3.bf16.msra.mxu1 %v770_v43  ;;  %v657_v3 = vld [vmem:[%s1121_s7] ss:$0 sm:$0xff] }
  0x18   :  { %728 = vmatprep.subr.bf16.mxu0 %v829_v8  ;;  %712 = vmatprep.subr.bf16.mxu1 %v829_v8  ;;  %v775_v14 = vld [vmem:[%s1124_s10] sm:$0xff]  }
  0x19   :  { %v665_v29 = vld [vmem:[%s1125_s11] ss:$0 sm:$0xff] }
  0x76   :  { %v753_v31 = vpop.permute.xlu0 %752 }
  0x77   :  { %v755_v32 = vunpack.i.h.bf16 %v753_v31  ;;  %v754_v33 = vunpack.i.l.bf16 %v753_v31 }
  0x79   :  { %v108_v37 = vsel %vm107_vm7, %v76_v24, %v754_v33  ;;  %v109_v38 = vsel %vm107_vm7, %v77_v27, %v755_v32 }
  0x7f   :  { %v758_v34 = vpop.permute.xlu0 %757 }
  0x80   :  { %v760_v35 = vunpack.i.h.bf16 %v758_v34  ;;  %v759_v36 = vunpack.i.l.bf16 %v758_v34 }
  0x82   :  { %v111_v39 = vsel %vm110_vm8, %v108_v37, %v759_v36  ;;  %v112_v40 = vsel %vm110_vm8, %v109_v38, %v760_v35 }
  0x83   :  { %v113_v41 = vpack.c.bf16 %v112_v40, %v111_v39  ;;  %v533_v39 = vld [vmem:[%s1115_s1] sm:$0xff] }
  0x85   :  { %701 = vmatmul.mubr.msk.bf16.vlgmr.msra.gmra.mrb[0].mxu0 %vm169_vm9, %v113_v41 }
  0x86   :  { %732 = vmatprep.mubr.msk.bf16.mxu0 %vm831_vm6, %v829_v8  ;;  %729 = vmatpush3.bf16.msra.mxu0 %v775_v14 }
  0x87   :  { %730 = vmatprep.subr.bf16.mxu0 %v829_v8 }
  0x8a   :  { %731 = vmatpush3.bf16.msra.mxu0 %v776_v15 }
 0x158   :  { %v207_v45 = vpop.f32.mrb[0].mxu0 }
 0x159   :  { %v985_v46 = vadd.f32 %v645_v44, %v207_v45  ;;  %v702_v47 = vpop.f32.mrb[1].mxu0 }
 0x15a   :  { %v210_v48 = vpop.f32.mrb[2].mxu0 }
 0x15b   :  { %v987_v49 = vadd.f32 %v645_v44, %v210_v48  ;;  %v703_v50 = vpop.f32.mrb[3].mxu0  ;;  %v214_v51 = vmax.f32 %v985_v46, 0.0 }
 0x15d   :  { %v215_v52 = vmax.f32 %v987_v49, 0.0 }
 0x15f   :  { %v216_v54 = vpack.c.bf16 %v215_v52, %v214_v51 }
 0x161   :  { %709 = vmatmul.mubr.msk.bf16.vlgmr.msra.gmra.mrb[0].mxu1 %vm107_vm7, %v216_v54 }
 0x162   :  { %713 = vmatpush3.bf16.msra.mxu1 %v771_v53  ;;  %716 = vmatprep.mubr.msk.bf16.mxu1 %vm831_vm6, %v829_v8 }
 0x163   :  { %714 = vmatprep.subr.bf16.mxu1 %v829_v8 }
 0x166   :  { %715 = vmatpush3.bf16.msra.mxu1 %v772_v55 }
 0x167   :  { %720 = vmatprep.subr.bf16.mxu1 %v829_v8 }
 0x169   :  { %717 = vmatmul.mubr.msk.bf16.vlgmr.msra.gmra.mrb[4].mxu1 %vm107_vm7, %v216_v54  ;;  %v534_v54 = vld [vmem:[%s1115_s1 + $0x8] sm:$0xff]  ;;  %s834_s1 = smov 48  }
 0x16a   :  { %724 = vmatprep.mubr.msk.bf16.mxu1 %vm831_vm6, %v829_v8  ;;  %721 = vmatpush3.bf16.msra.mxu1 %v773_v56 }
 0x16b   :  { %722 = vmatprep.subr.bf16.mxu1 %v829_v8  ;;  %v661_v8 = vld [vmem:[%s1123_s9] ss:$0 sm:$0xff] }
 0x16e   :  { %723 = vmatpush3.bf16.msra.mxu1 %v774_v57 }
 0x234   :  { %v277_v59 = vpop.f32.mrb[0].mxu1 }
 0x235   :  { %v1019_v60 = vadd.f32 %v653_v58, %v277_v59  ;;  %v710_v61 = vpop.f32.mrb[1].mxu1 }
 0x236   :  { %v280_v62 = vpop.f32.mrb[2].mxu1 }
 0x237   :  { %v1021_v63 = vadd.f32 %v653_v58, %v280_v62  ;;  %v711_v0 = vpop.f32.mrb[3].mxu1  ;;  %v285_v1 = vsel %vm284_vm10, %v1019_v60, -inf }
 0x238   :  { %286 = vmax.xlane.f32.xlu0 %v285_v1  ;;  %v536_v0 = vand.u32 127, %v48_v2 }
 0x239   :  { %v288_v38 = vsel %vm284_vm10, %v1021_v63, -inf }
 0x23c   :  { %v366_v4 = vpop.f32.mrb[4].mxu1 }
 0x23d   :  { %v367_v5 = vadd.f32 %v657_v3, %v366_v4  ;;  %v718_v6 = vpop.f32.mrb[5].mxu1 }
 0x23e   :  { %v369_v7 = vpop.f32.mrb[6].mxu1 }
 0x23f   :  { %v370_v9 = vadd.f32 %v657_v3, %v369_v7  ;;  %v719_v10 = vpop.f32.mrb[7].mxu1  ;;  %v373_v11 = vmax.f32 %v367_v5, 0.0 }
 0x241   :  { %v374_v12 = vmax.f32 %v370_v9, 0.0 }
 0x243   :  { %v375_v13 = vpack.c.bf16 %v374_v12, %v373_v11 }
 0x245   :  { %725 = vmatmul.mubr.msk.bf16.vlgmr.msra.gmra.mrb[8].mxu1 %vm107_vm7, %v375_v13 }
 0x2c5   :  { %v287_v16 = vpop.xlane.xlu0 %286 }
 0x2c6   :  { %v1037_v17 = vsub.f32 %v1019_v60, %v287_v16 }
 0x2c8   :  { %v293_v18 = vmul.f32 1.442695, %v1037_v17 }
 0x2ca   :  { %777 = vpow2.f32 %v293_v18 }
 0x2d4   :  { %v778_v19 = vpop.eup %777 }
 0x2d5   :  { %v297_v20 = vsel %vm284_vm10, %v778_v19, 0.0 }
 0x2d6   :  { %298 = vadd.xlane.f32.xlu0 %v297_v20 }
 0x318   :  { %v436_v21 = vpop.f32.mrb[8].mxu1 }
 0x319   :  { %v726_v22 = vpop.f32.mrb[9].mxu1  ;;  %v1044_v24 = vadd.f32 %v661_v8, %v436_v21 }
 0x31a   :  { %v439_v23 = vpop.f32.mrb[10].mxu1 }
 0x31b   :  { %v1046_v25 = vadd.f32 %v661_v8, %v439_v23  ;;  %v727_v26 = vpop.f32.mrb[11].mxu1 }
 0x31d   :  { %v443_v27 = vpack.c.bf16 %v1046_v25, %v1044_v24 }
 0x31f   :  { %733 = vmatmul.mubr.msk.bf16.vlgmr.msra.gmra.mrb[4].mxu0 %vm107_vm7, %v443_v27 }
 0x363   :  { %v299_v16 = vpop.xlane.xlu0 %298 }
 0x3f2   :  { %v504_v30 = vpop.f32.mrb[4].mxu0 }
 0x3f3   :  { %v505_v31 = vadd.f32 %v665_v29, %v504_v30  ;;  %v734_v32 = vpop.f32.mrb[5].mxu0 }
 0x3f4   :  { %v507_v33 = vpop.f32.mrb[6].mxu0 }
 0x3f5   :  { %v508_v34 = vadd.f32 %v665_v29, %v507_v33  ;;  %v735_v35 = vpop.f32.mrb[7].mxu0  ;;  %v511_v36 = vsel %vm107_vm7, %v505_v31, -inf }
 0x3f6   :  { %512 = vmax.xlane.f32.xlu1 %v511_v36 }
 0x3f7   :  { %v514_v37 = vsel %vm107_vm7, %v508_v34, -inf }
 0x3fa   :  { %515 = vmax.xlane.f32.xlu1 %v514_v37 }
 0x3fe   :  { %289 = vmax.xlane.f32.xlu1 %v288_v38 }
 0x40f   :  { %538 = vperm.xlu1 %761, %v533_v39  }
 0x483   :  { %v513_v40 = vpop.xlane.xlu1 %512 }
 0x484   :  { %v517_v41 = vsub.f32 %v505_v31, %v513_v40 }
 0x486   :  { %v519_v42 = vmul.f32 1.442695, %v517_v41 }
 0x487   :  { %v516_v43 = vpop.xlane.xlu1 %515 }
 0x488   :  { %779 = vpow2.f32 %v519_v42  ;;  %v518_v44 = vsub.f32 %v508_v34, %v516_v43 }
 0x48a   :  { %v521_v45 = vmul.f32 1.442695, %v518_v44 }
 0x48b   :  { %v290_v55 = vpop.xlane.xlu1 %289 }
 0x48c   :  { %781 = vpow2.f32 %v521_v45  ;;  %v292_v56 = vsub.f32 %v1021_v63, %v290_v55 }
 0x48e   :  { %v295_v57 = vmul.f32 1.442695, %v292_v56 }
 0x48f   :  { %v539_v61 = vpop.permute.xlu1 %538 }
 0x490   :  { %783 = vpow2.f32 %v295_v57  ;;  %vm543_vm11 = vcmp.eq.s32.totalorder %v536_v0, %v539_v61 }
 0x491   :  { %v545_v3 = vsel %vm543_vm11, %v517_v41, 0.0 }
 0x492   :  { %v780_v47 = vpop.eup %779  ;;  %v547_v7 = vsel %vm107_vm7, %v545_v3, 0.0 }
 0x493   :  { %v523_v48 = vsel %vm107_vm7, %v780_v47, 0.0 }
 0x494   :  { %524 = vadd.xlane.f32.xlu1 %v523_v48 }
 0x496   :  { %v782_v50 = vpop.eup %781 }
 0x497   :  { %v526_v53 = vsel %vm107_vm7, %v782_v50, 0.0 }
 0x498   :  { %527 = vadd.xlane.f32.xlu1 %v526_v53 }
 0x49a   :  { %v784_v58 = vpop.eup %783 }
 0x49b   :  { %v300_v59 = vsel %vm284_vm10, %v784_v58, 0.0 }
 0x4a9   :  { %541 = vperm.xlu1 %761, %v534_v54  }
 0x4cd   :  { %301 = vadd.xlane.f32.xlu1 %v300_v59 }
 0x521   :  { %v525_v62 = vpop.xlane.xlu1 %524 }
 0x522   :  { %785 = vlog2.f32 %v525_v62 }
 0x525   :  { %v528_v1 = vpop.xlane.xlu1 %527 }
 0x526   :  { %787 = vlog2.f32 %v528_v1 }
 0x527   :  { %789 = vlog2.f32 %v299_v16 }
 0x529   :  { %v542_v4 = vpop.permute.xlu1 %541 }
 0x52a   :  { %vm544_vm12 = vcmp.eq.s32.totalorder %v536_v0, %v542_v4 }
 0x52b   :  { %v546_v5 = vsel %vm544_vm12, %v518_v44, 0.0 }
 0x52c   :  { %v786_v6 = vpop.eup %785  ;;  %v548_v9 = vsel %vm107_vm7, %v546_v5, 0.0 }
 0x52d   :  { %v549_v10 = vadd.f32 %v548_v9, %v547_v7  ;;  %v530_v11 = vmul.f32 0.6931472, %v786_v6 }
 0x52f   :  { %550 = vadd.xlane.f32.xlu0 %v549_v10  ;;  %v560_v2 = vsel %vm559_vm13, %v530_v11, 0.0 }
 0x530   :  { %v788_v12 = vpop.eup %787 }
 0x531   :  { %v532_v13 = vmul.f32 0.6931472, %v788_v12  ;;  %v790_v18 = vpop.eup %789 }
 0x532   :  { %v304_v19 = vmul.f32 0.6931472, %v790_v18 }
 0x533   :  { %v561_v14 = vsel %vm559_vm13, %v532_v13, 0.0 }
 0x534   :  { %v562_v15 = vadd.f32 %v561_v14, %v560_v2  ;;  %v307_v20 = vsub.f32 %v1037_v17, %v304_v19 }
 0x536   :  { %563 = vadd.xlane.f32.xlu0 %v562_v15 }
 0x54c   :  { %579 = vrot.lane.b32.xlu0 %v1019_v60, %s830_s0 }
 0x550   :  { %581 = vrot.lane.b32.xlu0 %v1021_v63, %s830_s0  ;;  %s836_s0 = smov [#allocation2]  }
 0x554   :  { %587 = vrot.lane.b32.xlu0 %v307_v20, %s834_s1 }
 0x558   :  { %595 = vrot.lane.b32.xlu0 %v1044_v24, %s832_s20 }
 0x55a   :  { %v302_v8 = vpop.xlane.xlu1 %301 }
 0x55b   :  { %791 = vlog2.f32 %v302_v8 }
 0x55c   :  { %597 = vrot.lane.b32.xlu0 %v1046_v25, %s832_s20  ;;  %s621_s20 = sshll.u32 %s836_s0, 4  ;;  %s622_s20 = int_to_ptr.vmem [resolvable:$true] %s621_s20 }
 0x55d   :  { %s793_s29 = scalar_lea.vmem %s622_s20, 256  ;;  %p798_p1 = scmp.lt.s32.totalorder %s622_s20, %s622_s20 }
 0x55e   :  { %p794_p0 = scmp.ne.s32.totalorder %s622_s20, %s793_s29  ;;  %p799_p2 = scmp.lt.s32.totalorder %s793_s29, %s793_s29 }
 0x560   :  { %p800_p3 = por %p799_p2, %p798_p1 }
 0x562   :  { %p801_p4 = pnand %p800_p3, %p794_p0 }
 0x565   :  { %v792_v21 = vpop.eup %791 }
 0x566   :  { %v306_v22 = vmul.f32 0.6931472, %v792_v21 }
 0x568   :  { %v308_v23 = vsub.f32 %v292_v56, %v306_v22 }
 0x56a   :  { %589 = vrot.lane.b32.xlu1 %v308_v23, %s834_s1 }
 0x5bc   :  { %v551_v60 = vpop.xlane.xlu0 %550 }
 0x5bd   :  { %v552_v63 = vrot.slane %v551_v60, 4 }
 0x5bf   :  { %v553_v26 = vadd.f32 %v552_v63, %v551_v60 }
 0x5c1   :  { %v554_v17 = vrot.slane %v553_v26, 2 }
 0x5c3   :  { %v564_v27 = vpop.xlane.xlu0 %563  ;;  %v555_v28 = vadd.f32 %v554_v17, %v553_v26 }
 0x5c4   :  { %v565_v29 = vrot.slane %v564_v27, 4 }
 0x5c5   :  { %v556_v30 = vrot.slane %v555_v28, 1 }
 0x5c6   :  { %v566_v24 = vadd.f32 %v565_v29, %v564_v27 }
 0x5c7   :  { %v580_v31 = vpop.permute.xlu0 %579  ;;  %v557_v32 = vadd.f32 %v556_v30, %v555_v28 }
 0x5c8   :  { %v567_v33 = vrot.slane %v566_v24, 2  ;;  %v601_v38 = vsel %vm107_vm7, %v214_v51, %v580_v31 }
 0x5c9   :  { %736 = vpush %v557_v32 }
 0x5ca   :  { %v568_v25 = vadd.f32 %v567_v33, %v566_v24 }
 0x5cb   :  { %v582_v34 = vpop.permute.xlu0 %581 }
 0x5cc   :  { %v569_v35 = vrot.slane %v568_v25, 1  ;;  %v602_v43 = vsel %vm107_vm7, %v215_v52, %v582_v34 }
 0x5ce   :  { %v570_v36 = vadd.f32 %v569_v35, %v568_v25 }
 0x5cf   :  { %v588_v37 = vpop.permute.xlu0 %587 }
 0x5d0   :  { %738 = vpush %v570_v36  ;;  %v604_v39 = vsel %vm603_vm14, %v601_v38, %v588_v37 }
 0x5d3   :  { %v596_v40 = vpop.permute.xlu0 %595 }
 0x5d4   :  { %v606_v41 = vsel %vm110_vm8, %v604_v39, %v596_v40 }
 0x5d5   :  { %v608_v42 = vsel %vm169_vm9, %v606_v41, 0.0 }
 0x5d6   :  { %610 = vst [vmem:[#allocation2] sm:$0xff] %v608_v42 }
 0x5d7   :  { %v598_v45 = vpop.permute.xlu0 %597 }
 0x5dc   :  { %v590_v44 = vpop.permute.xlu1 %589 }
 0x5dd   :  { %v605_v47 = vsel %vm603_vm14, %v602_v43, %v590_v44 }
 0x5de   :  { %v607_v46 = vsel %vm110_vm8, %v605_v47, %v598_v45 }
 0x5df   :  { %v609_v51 = vsel %vm169_vm9, %v607_v46, 0.0 }
 0x5e0   :  { %611 = vst [vmem:[#allocation2 + $0x8] sm:$0xff] %v609_v51 }
 0x5e1   :  { %804 = shalt.err (!%p801_p4)
}
 0x5e2   :  { %s805_s3 = scalar_lea.hbm %s1126_s12, 256 }
 0x5e3   :  { %p806_p5 = scmp.ne.s32.totalorder %s1126_s12, %s805_s3  ;;  %p809_p6 = scmp.lt.u32.totalorder %s805_s3, %s1126_s12 }
 0x5e5   :  { %p811_p7 = pnand %p809_p6, %p806_p5 }
 0x5e7   :  { %814 = shalt.err (!%p811_p7)
}
 0x5e8   :  { %s837_s17 = smov 128   ;;  %s838_s18 = smov 8  }
 0x5e9   :  { %627 = dma.vmem_to_hbm [thread:$0]  %s622_s20, 256, %s1126_s12, [#allocation3], %s837_s17, %s837_s17, %s838_s18  }
 0x5ea   :  { %s815_s10 = scalar_lea.hbm %s1127_s13, 16 }
 0x5eb   :  { %p816_p8 = scmp.ne.s32.totalorder %s1127_s13, %s815_s10  ;;  %p819_p9 = scmp.lt.u32.totalorder %s815_s10, %s1127_s13 }
 0x5ed   :  { %p821_p10 = pnand %p819_p9, %p816_p8 }
 0x5fa   :  { %s737_s8 = spop %736 }
 0x601   :  { %s739_s5 = spop %738 }
 0x602   :  { %s572_s22 = ssub.f32 %s737_s8, %s739_s5 }
 0x604   :  { %s573_s23 = ssub.f32 0.0, %s572_s22 }
 0x606   :  { %s576_s7 = smul.f32 0.0625, %s573_s23 }
 0x608   :  { %615 = sst [smem:[#allocation5 + $0x1]] %s576_s7 }
 0x609   :  { %824 = shalt.err (!%p821_p10)
}
 0x60a   :  { %s839_s12 = smov [#allocation5]  }
 0x60b   :  { %635 = dma.smem_to_hbm %s839_s12, 16, %s1127_s13, [#allocation4]  }
 0x60c   :  { %825 = dma.done.wait [#allocation3], 256  }
 0x60d   :  { %826 = vsyncadd [#allocation3], 4294967040 }
 0x60e   :  { %827 = dma.done.wait [#allocation4], 16  }
 0x60f   :  { %828 = vsyncadd [#allocation4], 4294967280 }
 0x610   :  { %642 = sfence }
 0x611   :  { %643 = vsyncpa [#allocation3], 1 }
 0x612   :  { %644 = vsyncpa [#allocation4], 1 }

</bundles_post_ra>
